<compile_context>
chip_gen: v7x
topology: tpu7x:2x2x1
jax: 0.10.0
libtpu: 0.0.40
codegen_flags: <defaults>
</compile_context>

<pallas_src>
import functools

import numpy as np
import jax
import jax.numpy as jnp
from jax import lax
from jax.experimental import pallas as pl
from jax.experimental.pallas import tpu as pltpu


def _round_up(x, m):
    return ((x + m - 1) // m) * m


def _pick_batch_tile(B):
    # Keep >=2 and an even number of grid tiles when batch allows (v7x has two
    # TensorCores sharing the "parallel" axis); TB=256 only when it preserves
    # an even tile count.
    if B > 512:
        n256 = -(-B // 256)
        if n256 % 2 == 0:
            return 256
    return 128


# ---------------------------------------------------------------------------
# Kernel: whole LeNet forward for one batch tile (batch in lanes).
# ---------------------------------------------------------------------------
def _lenet_kernel(x_ref, w1_ref, b1_ref, w2_ref, b2_ref,
                  wf1_ref, bf1_ref, wf2_ref, bf2_ref, wf3_ref, bf3_ref,
                  o_ref, *, r1h, r2h):
    f32, bf16 = jnp.float32, jnp.bfloat16

    xb = x_ref[...].astype(bf16)                                    # (L+4, TB)

    # conv1 at every position, rows grouped by pool-1 parity -> max -> +b -> ReLU
    h1 = jnp.dot(w1_ref[...], xb, preferred_element_type=f32)       # (2*r1h, TB)
    p1 = jnp.maximum(jnp.maximum(h1[:r1h], h1[r1h:]) + b1_ref[...], 0.0)

    # conv2, pool-2, bias, ReLU; rows come out in PyTorch flatten order.
    h2 = jnp.dot(w2_ref[...], p1.astype(bf16),
                 preferred_element_type=f32)                        # (2*r2h, TB)
    ft = jnp.maximum(jnp.maximum(h2[:r2h], h2[r2h:]) + b2_ref[...], 0.0)

    # FC stack, batch stays in lanes.
    a1 = jnp.maximum(jnp.dot(wf1_ref[...], ft.astype(bf16),
                             preferred_element_type=f32) + bf1_ref[...], 0.0)
    a2 = jnp.maximum(jnp.dot(wf2_ref[...], a1.astype(bf16),
                             preferred_element_type=f32) + bf2_ref[...], 0.0)
    o_ref[...] = (jnp.dot(wf3_ref[...], a2.astype(bf16),
                          preferred_element_type=f32) + bf3_ref[...])


# ---------------------------------------------------------------------------
# Wrapper-side weight packing (host numpy index maps + one XLA gather each).
# ---------------------------------------------------------------------------
def _pack_conv1(w1, L, r1h):
    """(6,1,5) -> (2*r1h, L+4) bf16 Toeplitz matrix.

    Row br*r1h + c*Lp1 + p computes conv1(channel c) at position 2p+br, so the
    two pool-1 partners sit r1h rows apart.  Padding rows are zero.
    """
    Lp1 = L // 2
    K = L + 4
    idx = np.zeros((2 * r1h, K), np.int32)
    msk = np.zeros((2 * r1h, K), np.float32)
    for br in range(2):
        for c in range(6):
            for p in range(Lp1):
                r = br * r1h + c * Lp1 + p
                t = 2 * p + br
                for k in range(5):
                    idx[r, t + k] = c * 5 + k
                    msk[r, t + k] = 1.0
    flat = w1.reshape(-1).astype(jnp.float32)
    return (jnp.take(flat, jnp.asarray(idx)) * jnp.asarray(msk)).astype(jnp.bfloat16)


def _pack_conv2(w2, L, r1h, r2h):
    """(16,6,5) -> (2*r2h, r1h) bf16 Toeplitz matrix.

    Row br*r2h + o*Lp2 + m computes conv2(channel o) at position 2m+br;
    column c*Lp1 + p reads pool-1 channel c, position p.  Padding rows and
    columns are zero (they line up with the zero padding rows of p1).
    """
    Lp1 = L // 2
    Lp2 = (Lp1 - 4) // 2
    idx = np.zeros((2 * r2h, r1h), np.int32)
    msk = np.zeros((2 * r2h, r1h), np.float32)
    for br in range(2):
        for o in range(16):
            for m in range(Lp2):
                r = br * r2h + o * Lp2 + m
                j = 2 * m + br
                for c in range(6):
                    for k in range(5):
                        q = c * Lp1 + j + k
                        idx[r, q] = (o * 6 + c) * 5 + k
                        msk[r, q] = 1.0
    flat = w2.reshape(-1).astype(jnp.float32)
    return (jnp.take(flat, jnp.asarray(idx)) * jnp.asarray(msk)).astype(jnp.bfloat16)


def lenet_forward(x, params, output_length):
    """x: (B, input_length) float32, PyTorch semantics (NCL after unsqueeze)."""
    w1, b1, w2, b2, W1, bf1, W2, bf2, W3, bf3 = params
    B, L = x.shape
    assert L % 4 == 0 and L >= 12, "input_length must be a multiple of 4, >= 12"
    Lp1 = L // 2
    Lp2 = (Lp1 - 4) // 2
    flat = 16 * Lp2
    K1 = L + 4
    out_len = output_length

    r1h = _round_up(6 * Lp1, 8)     # rows per pool-1 parity branch (8-aligned)
    r2h = _round_up(16 * Lp2, 8)    # rows per pool-2 parity branch == padded flatten

    TB = _pick_batch_tile(B)
    B_pad = _round_up(B, TB)
    n_tiles = B_pad // TB

    # Input: batch in lanes, zero-padded positions in sublanes.
    xT = jnp.pad(x.astype(jnp.float32), ((0, B_pad - B), (2, 2))).T   # (K1, B_pad)
    # TODO(synk): for very large batches, accept x batch-minor upstream so this
    # transpose fuses with the producer instead of an extra HBM round-trip.

    w1big = _pack_conv1(w1, L, r1h)                                   # (2*r1h, K1)
    w2big = _pack_conv2(w2, L, r1h, r2h)                              # (2*r2h, r1h)
    b1rep = jnp.pad(jnp.repeat(b1.astype(jnp.float32), Lp1),
                    (0, r1h - 6 * Lp1))[:, None]                      # (r1h, 1)
    b2rep = jnp.pad(jnp.repeat(b2.astype(jnp.float32), Lp2),
                    (0, r2h - 16 * Lp2))[:, None]                     # (r2h, 1)

    wf1 = jnp.pad(W1.astype(jnp.float32),
                  ((0, 0), (0, r2h - flat))).astype(jnp.bfloat16)     # (120, r2h)
    wf2 = W2.astype(jnp.bfloat16)
    wf3 = W3.astype(jnp.bfloat16)
    bf1c = bf1.astype(jnp.float32)[:, None]
    bf2c = bf2.astype(jnp.float32)[:, None]
    bf3c = bf3.astype(jnp.float32)[:, None]

    kernel = functools.partial(_lenet_kernel, r1h=r1h, r2h=r2h)

    def const(shape):
        return pl.BlockSpec(shape, lambda i: (0,) * len(shape))

    mm_macs = (2 * r1h * K1 + 2 * r2h * r1h + 120 * r2h + 84 * 120 + out_len * 84)
    flops = 2 * B_pad * mm_macs
    bytes_accessed = (4 * B_pad * (K1 + out_len) + 2 * mm_macs
                      + 4 * (r1h + r2h + 120 + 84 + out_len))

    out = pl.pallas_call(
        kernel,
        out_shape=jax.ShapeDtypeStruct((out_len, B_pad), jnp.float32),
        grid=(n_tiles,),
        in_specs=[
            pl.BlockSpec((K1, TB), lambda i: (0, i)),        # input tile
            const((2 * r1h, K1)), const((r1h, 1)),           # conv1 (Toeplitz)
            const((2 * r2h, r1h)), const((r2h, 1)),          # conv2 (Toeplitz)
            const((120, r2h)), const((120, 1)),              # fc1
            const((84, 120)), const((84, 1)),                # fc2
            const((out_len, 84)), const((out_len, 1)),       # fc3
        ],
        out_specs=pl.BlockSpec((out_len, TB), lambda i: (0, i)),
        compiler_params=pltpu.CompilerParams(
            dimension_semantics=("parallel",),
            vmem_limit_bytes=32 * 1024 * 1024),
        cost_estimate=pl.CostEstimate(flops=flops, transcendentals=0,
                                      bytes_accessed=bytes_accessed),
    )(xT, w1big, b1rep, w2big, b2rep, wf1, bf1c, wf2, bf2c, wf3, bf3c)

    return out[:, :B].T                                       # (B, out_len)


# ---------------------------------------------------------------------------
# Pure-JAX reference (matches the PyTorch forward) and init.
# ---------------------------------------------------------------------------
def lenet_reference(x, params):
    w1, b1, w2, b2, W1, bf1, W2, bf2, W3, bf3 = params
    B, L = x.shape
    y = lax.conv_general_dilated(x[:, None, :], w1, (1,), [(2, 2)],
                                 dimension_numbers=('NCH', 'OIH', 'NCH'))
    y = jax.nn.relu(y + b1[None, :, None])
    y = y.reshape(B, 6, L // 2, 2).max(-1)
    y = lax.conv_general_dilated(y, w2, (1,), [(0, 0)],
                                 dimension_numbers=('NCH', 'OIH', 'NCH'))
    y = jax.nn.relu(y + b2[None, :, None])
    Lc2 = L // 2 - 4
    y = y.reshape(B, 16, Lc2 // 2, 2).max(-1)
    f = y.reshape(B, -1)
    f = jax.nn.relu(f @ W1.T + bf1)
    f = jax.nn.relu(f @ W2.T + bf2)
    return f @ W3.T + bf3


def init_params(key, input_length, output_length):
    Lp2 = (input_length // 2 - 4) // 2
    flat = 16 * Lp2
    ks = jax.random.split(key, 10)

    def u(k, shape, fan_in):
        bound = 1.0 / (fan_in ** 0.5)
        return jax.random.uniform(k, shape, jnp.float32, -bound, bound)

    w1 = u(ks[0], (6, 1, 5), 1 * 5)
    b1 = u(ks[1], (6,), 1 * 5)
    w2 = u(ks[2], (16, 6, 5), 6 * 5)
    b2 = u(ks[3], (16,), 6 * 5)
    W1 = u(ks[4], (120, flat), flat)
    bf1 = u(ks[5], (120,), flat)
    W2 = u(ks[6], (84, 120), 120)
    bf2 = u(ks[7], (84,), 120)
    W3 = u(ks[8], (output_length, 84), 84)
    bf3 = u(ks[9], (output_length,), 84)
    return (w1, b1, w2, b2, W1, bf1, W2, bf2, W3, bf3)


if __name__ == "__main__":
    input_length = 32
    output_length = 10
    batch = 2

    key = jax.random.PRNGKey(0)
    kx, kp = jax.random.split(key)
    x = jax.random.normal(kx, (batch, input_length), dtype=jnp.float32)
    params = init_params(kp, input_length, output_length)

    out = lenet_forward(x, params, output_length)
    out = jax.block_until_ready(out)

    ref = lenet_reference(x, params)
    assert out.shape == (batch, output_length)
    assert jnp.allclose(out, ref, atol=2e-2, rtol=2e-2), (out, ref)
    print("KERNEL_OK")
</pallas_src>

<mosaic_0001>
module attributes {stable_mosaic.version = 11 : i64} {
  func.func @_lenet_kernel(%arg0: i32, %arg1: memref<36x128xf32, #tpu.memory_space<vmem>>, %arg2: memref<192x36xbf16, #tpu.memory_space<vmem>>, %arg3: memref<96x1xf32, #tpu.memory_space<vmem>>, %arg4: memref<192x96xbf16, #tpu.memory_space<vmem>>, %arg5: memref<96x1xf32, #tpu.memory_space<vmem>>, %arg6: memref<120x96xbf16, #tpu.memory_space<vmem>>, %arg7: memref<120x1xf32, #tpu.memory_space<vmem>>, %arg8: memref<84x120xbf16, #tpu.memory_space<vmem>>, %arg9: memref<84x1xf32, #tpu.memory_space<vmem>>, %arg10: memref<10x84xbf16, #tpu.memory_space<vmem>>, %arg11: memref<10x1xf32, #tpu.memory_space<vmem>>, %arg12: memref<10x128xf32, #tpu.memory_space<vmem>>) attributes {dimension_semantics = [#tpu.dimension_semantics<parallel>], iteration_bounds = array<i64: 1>, scalar_prefetch = 0 : i64, scratch_operands = 0 : i64, tpu.core_type = #tpu.core_type<tc>, window_params = [{transform_indices = @transform_0, window_bounds = array<i64: 36, 128>}, {pipeline_mode = #tpu.pipeline_mode<synchronous>, transform_indices = @transform_1, window_bounds = array<i64: 192, 36>}, {pipeline_mode = #tpu.pipeline_mode<synchronous>, transform_indices = @transform_2, window_bounds = array<i64: 96, 1>}, {pipeline_mode = #tpu.pipeline_mode<synchronous>, transform_indices = @transform_3, window_bounds = array<i64: 192, 96>}, {pipeline_mode = #tpu.pipeline_mode<synchronous>, transform_indices = @transform_4, window_bounds = array<i64: 96, 1>}, {pipeline_mode = #tpu.pipeline_mode<synchronous>, transform_indices = @transform_5, window_bounds = array<i64: 120, 96>}, {pipeline_mode = #tpu.pipeline_mode<synchronous>, transform_indices = @transform_6, window_bounds = array<i64: 120, 1>}, {pipeline_mode = #tpu.pipeline_mode<synchronous>, transform_indices = @transform_7, window_bounds = array<i64: 84, 120>}, {pipeline_mode = #tpu.pipeline_mode<synchronous>, transform_indices = @transform_8, window_bounds = array<i64: 84, 1>}, {pipeline_mode = #tpu.pipeline_mode<synchronous>, transform_indices = @transform_9, window_bounds = array<i64: 10, 84>}, {pipeline_mode = #tpu.pipeline_mode<synchronous>, transform_indices = @transform_10, window_bounds = array<i64: 10, 1>}, {transform_indices = @transform_11, window_bounds = array<i64: 10, 128>}]} {
    %c0 = arith.constant 0 : index
    %c0_0 = arith.constant 0 : index
    %0 = vector.load %arg1[%c0, %c0_0] : memref<36x128xf32, #tpu.memory_space<vmem>>, vector<36x128xf32>
    %1 = arith.truncf %0 : vector<36x128xf32> to vector<36x128xbf16>
    %c0_1 = arith.constant 0 : index
    %c0_2 = arith.constant 0 : index
    %2 = vector.load %arg2[%c0_1, %c0_2] : memref<192x36xbf16, #tpu.memory_space<vmem>>, vector<192x36xbf16>
    %cst = arith.constant dense<0.000000e+00> : vector<192x128xf32>
    %3 = tpu.matmul %2, %1, %cst {dimension_numbers = #tpu.dot_dimension_numbers<[1], [0], [0], [1], [0, 0, 1, 1], [], []>} : vector<192x36xbf16>, vector<36x128xbf16>, vector<192x128xf32> -> vector<192x128xf32>
    %4 = vector.extract_strided_slice %3 {offsets = [0, 0], sizes = [96, 128], strides = [1, 1]} : vector<192x128xf32> to vector<96x128xf32>
    %5 = vector.extract_strided_slice %3 {offsets = [96, 0], sizes = [96, 128], strides = [1, 1]} : vector<192x128xf32> to vector<96x128xf32>
    %6 = arith.maximumf %4, %5 : vector<96x128xf32>
    %c0_3 = arith.constant 0 : index
    %c0_4 = arith.constant 0 : index
    %7 = vector.load %arg3[%c0_3, %c0_4] : memref<96x1xf32, #tpu.memory_space<vmem>>, vector<96x1xf32>
    %8 = vector.broadcast %7 : vector<96x1xf32> to vector<96x128xf32>
    %9 = arith.addf %6, %8 : vector<96x128xf32>
    %cst_5 = arith.constant 0.000000e+00 : f32
    %10 = vector.broadcast %cst_5 : f32 to vector<96x128xf32>
    %11 = arith.maximumf %9, %10 : vector<96x128xf32>
    %c0_6 = arith.constant 0 : index
    %c0_7 = arith.constant 0 : index
    %12 = vector.load %arg4[%c0_6, %c0_7] : memref<192x96xbf16, #tpu.memory_space<vmem>>, vector<192x96xbf16>
    %13 = arith.truncf %11 : vector<96x128xf32> to vector<96x128xbf16>
    %cst_8 = arith.constant dense<0.000000e+00> : vector<192x128xf32>
    %14 = tpu.matmul %12, %13, %cst_8 {dimension_numbers = #tpu.dot_dimension_numbers<[1], [0], [0], [1], [0, 0, 1, 1], [], []>} : vector<192x96xbf16>, vector<96x128xbf16>, vector<192x128xf32> -> vector<192x128xf32>
    %15 = vector.extract_strided_slice %14 {offsets = [0, 0], sizes = [96, 128], strides = [1, 1]} : vector<192x128xf32> to vector<96x128xf32>
    %16 = vector.extract_strided_slice %14 {offsets = [96, 0], sizes = [96, 128], strides = [1, 1]} : vector<192x128xf32> to vector<96x128xf32>
    %17 = arith.maximumf %15, %16 : vector<96x128xf32>
    %c0_9 = arith.constant 0 : index
    %c0_10 = arith.constant 0 : index
    %18 = vector.load %arg5[%c0_9, %c0_10] : memref<96x1xf32, #tpu.memory_space<vmem>>, vector<96x1xf32>
    %19 = vector.broadcast %18 : vector<96x1xf32> to vector<96x128xf32>
    %20 = arith.addf %17, %19 : vector<96x128xf32>
    %cst_11 = arith.constant 0.000000e+00 : f32
    %21 = vector.broadcast %cst_11 : f32 to vector<96x128xf32>
    %22 = arith.maximumf %20, %21 : vector<96x128xf32>
    %c0_12 = arith.constant 0 : index
    %c0_13 = arith.constant 0 : index
    %23 = vector.load %arg6[%c0_12, %c0_13] : memref<120x96xbf16, #tpu.memory_space<vmem>>, vector<120x96xbf16>
    %24 = arith.truncf %22 : vector<96x128xf32> to vector<96x128xbf16>
    %cst_14 = arith.constant dense<0.000000e+00> : vector<120x128xf32>
    %25 = tpu.matmul %23, %24, %cst_14 {dimension_numbers = #tpu.dot_dimension_numbers<[1], [0], [0], [1], [0, 0, 1, 1], [], []>} : vector<120x96xbf16>, vector<96x128xbf16>, vector<120x128xf32> -> vector<120x128xf32>
    %c0_15 = arith.constant 0 : index
    %c0_16 = arith.constant 0 : index
    %26 = vector.load %arg7[%c0_15, %c0_16] : memref<120x1xf32, #tpu.memory_space<vmem>>, vector<120x1xf32>
    %27 = vector.broadcast %26 : vector<120x1xf32> to vector<120x128xf32>
    %28 = arith.addf %25, %27 : vector<120x128xf32>
    %cst_17 = arith.constant 0.000000e+00 : f32
    %29 = vector.broadcast %cst_17 : f32 to vector<120x128xf32>
    %30 = arith.maximumf %28, %29 : vector<120x128xf32>
    %c0_18 = arith.constant 0 : index
    %c0_19 = arith.constant 0 : index
    %31 = vector.load %arg8[%c0_18, %c0_19] : memref<84x120xbf16, #tpu.memory_space<vmem>>, vector<84x120xbf16>
    %32 = arith.truncf %30 : vector<120x128xf32> to vector<120x128xbf16>
    %cst_20 = arith.constant dense<0.000000e+00> : vector<84x128xf32>
    %33 = tpu.matmul %31, %32, %cst_20 {dimension_numbers = #tpu.dot_dimension_numbers<[1], [0], [0], [1], [0, 0, 1, 1], [], []>} : vector<84x120xbf16>, vector<120x128xbf16>, vector<84x128xf32> -> vector<84x128xf32>
    %c0_21 = arith.constant 0 : index
    %c0_22 = arith.constant 0 : index
    %34 = vector.load %arg9[%c0_21, %c0_22] : memref<84x1xf32, #tpu.memory_space<vmem>>, vector<84x1xf32>
    %35 = vector.broadcast %34 : vector<84x1xf32> to vector<84x128xf32>
    %36 = arith.addf %33, %35 : vector<84x128xf32>
    %cst_23 = arith.constant 0.000000e+00 : f32
    %37 = vector.broadcast %cst_23 : f32 to vector<84x128xf32>
    %38 = arith.maximumf %36, %37 : vector<84x128xf32>
    %c0_24 = arith.constant 0 : index
    %c0_25 = arith.constant 0 : index
    %39 = vector.load %arg10[%c0_24, %c0_25] : memref<10x84xbf16, #tpu.memory_space<vmem>>, vector<10x84xbf16>
    %40 = arith.truncf %38 : vector<84x128xf32> to vector<84x128xbf16>
    %cst_26 = arith.constant dense<0.000000e+00> : vector<10x128xf32>
    %41 = tpu.matmul %39, %40, %cst_26 {dimension_numbers = #tpu.dot_dimension_numbers<[1], [0], [0], [1], [0, 0, 1, 1], [], []>} : vector<10x84xbf16>, vector<84x128xbf16>, vector<10x128xf32> -> vector<10x128xf32>
    %c0_27 = arith.constant 0 : index
    %c0_28 = arith.constant 0 : index
    %42 = vector.load %arg11[%c0_27, %c0_28] : memref<10x1xf32, #tpu.memory_space<vmem>>, vector<10x1xf32>
    %43 = vector.broadcast %42 : vector<10x1xf32> to vector<10x128xf32>
    %44 = arith.addf %41, %43 : vector<10x128xf32>
    %c0_29 = arith.constant 0 : index
    %c0_30 = arith.constant 0 : index
    %45 = vector.load %arg12[%c0_29, %c0_30] : memref<10x128xf32, #tpu.memory_space<vmem>>, vector<10x128xf32>
    tpu.vector_store %arg12[%c0_29, %c0_30], %44 {strides = array<i32>} : memref<10x128xf32, #tpu.memory_space<vmem>>, vector<10x128xf32>,
    return
  }
  func.func @transform_0(%arg0: i32) -> (i32, i32) {
    %c0_i32 = arith.constant 0 : i32
    %c0_i32_0 = arith.constant 0 : i32
    return %c0_i32, %arg0 : i32, i32
  }
  func.func @transform_1(%arg0: i32) -> (i32, i32) {
    %c0_i32 = arith.constant 0 : i32
    %c0_i32_0 = arith.constant 0 : i32
    %c0_i32_1 = arith.constant 0 : i32
    return %c0_i32, %c0_i32_0 : i32, i32
  }
  func.func @transform_2(%arg0: i32) -> (i32, i32) {
    %c0_i32 = arith.constant 0 : i32
    %c0_i32_0 = arith.constant 0 : i32
    %c0_i32_1 = arith.constant 0 : i32
    return %c0_i32, %c0_i32_0 : i32, i32
  }
  func.func @transform_3(%arg0: i32) -> (i32, i32) {
    %c0_i32 = arith.constant 0 : i32
    %c0_i32_0 = arith.constant 0 : i32
    %c0_i32_1 = arith.constant 0 : i32
    return %c0_i32, %c0_i32_0 : i32, i32
  }
  func.func @transform_4(%arg0: i32) -> (i32, i32) {
    %c0_i32 = arith.constant 0 : i32
    %c0_i32_0 = arith.constant 0 : i32
    %c0_i32_1 = arith.constant 0 : i32
    return %c0_i32, %c0_i32_0 : i32, i32
  }
  func.func @transform_5(%arg0: i32) -> (i32, i32) {
    %c0_i32 = arith.constant 0 : i32
    %c0_i32_0 = arith.constant 0 : i32
    %c0_i32_1 = arith.constant 0 : i32
    return %c0_i32, %c0_i32_0 : i32, i32
  }
  func.func @transform_6(%arg0: i32) -> (i32, i32) {
    %c0_i32 = arith.constant 0 : i32
    %c0_i32_0 = arith.constant 0 : i32
    %c0_i32_1 = arith.constant 0 : i32
    return %c0_i32, %c0_i32_0 : i32, i32
  }
  func.func @transform_7(%arg0: i32) -> (i32, i32) {
    %c0_i32 = arith.constant 0 : i32
    %c0_i32_0 = arith.constant 0 : i32
    %c0_i32_1 = arith.constant 0 : i32
    return %c0_i32, %c0_i32_0 : i32, i32
  }
  func.func @transform_8(%arg0: i32) -> (i32, i32) {
    %c0_i32 = arith.constant 0 : i32
    %c0_i32_0 = arith.constant 0 : i32
    %c0_i32_1 = arith.constant 0 : i32
    return %c0_i32, %c0_i32_0 : i32, i32
  }
  func.func @transform_9(%arg0: i32) -> (i32, i32) {
    %c0_i32 = arith.constant 0 : i32
    %c0_i32_0 = arith.constant 0 : i32
    %c0_i32_1 = arith.constant 0 : i32
    return %c0_i32, %c0_i32_0 : i32, i32
  }
  func.func @transform_10(%arg0: i32) -> (i32, i32) {
    %c0_i32 = arith.constant 0 : i32
    %c0_i32_0 = arith.constant 0 : i32
    %c0_i32_1 = arith.constant 0 : i32
    return %c0_i32, %c0_i32_0 : i32, i32
  }
  func.func @transform_11(%arg0: i32) -> (i32, i32) {
    %c0_i32 = arith.constant 0 : i32
    %c0_i32_0 = arith.constant 0 : i32
    return %c0_i32, %arg0 : i32, i32
  }
}

</mosaic_0001>

<bundles_post_ra>
// kernel: tpu_custom_call.1
= control target key start
LH: loop header
LB: loop body
LE: loop exit
PB: predicated region body
PF: predicated region fallthrough
CT: control target
= control target key end

     0   :  { %vm132_vm0 = vcmask 293888   ;;  %v1733_v6 = vmov 0   ;;  %vm169_vm1 = vcmask 1041408   ;;  %s2159_s0 = inlined_call_operand.vmem [shape: f32[36,128], index: 0, kind: input, shape index: {}]   ;;  %s2160_s1 = inlined_call_operand.vmem [shape: bf16[192,36], index: 1, kind: input, shape index: {}]   ;;  %s2161_s2 = inlined_call_operand.vmem [shape: f32[96,1], index: 2, kind: input, shape index: {}]   ;;  %s2162_s3 = inlined_call_operand.vmem [shape: bf16[192,96], index: 3, kind: input, shape index: {}]   ;;  %s2163_s4 = inlined_call_operand.vmem [shape: f32[96,1], index: 4, kind: input, shape index: {}]   ;;  %s2164_s5 = inlined_call_operand.vmem [shape: bf16[120,96], index: 5, kind: input, shape index: {}]   ;;  %s2165_s6 = inlined_call_operand.vmem [shape: f32[120,1], index: 6, kind: input, shape index: {}]   ;;  %s2166_s7 = inlined_call_operand.vmem [shape: bf16[84,120], index: 7, kind: input, shape index: {}]   ;;  %s2167_s8 = inlined_call_operand.vmem [shape: f32[84,1], index: 8, kind: input, shape index: {}]   ;;  %s2168_s9 = inlined_call_operand.vmem [shape: bf16[10,84], index: 9, kind: input, shape index: {}]   ;;  %s2169_s10 = inlined_call_operand.vmem [shape: f32[10,1], index: 10, kind: input, shape index: {}]   ;;  %s2170_s11 = inlined_call_operand.hbm [shape: f32[10,128], index: 11, kind: output, shape index: {}]  }
   0x1   :  { %v40_v0 = vld [vmem:[%s2159_s0] sm:$0xff]  ;;  %v41_v1 = vld [vmem:[%s2159_s0 + $0x8] sm:$0xff]  ;;  %v42_v2 = vld [vmem:[%s2159_s0 + $0x10] sm:$0xff]  ;;  %1668 = vset.pattern.permute.xlu0 %v1733_v6  ;;  %1669 = vset.pattern.permute.xlu1 %v1733_v6 }
   0x2   :  { %v45_v3 = vpack.c.bf16 %v41_v1, %v40_v0  ;;  %v43_v4 = vld [vmem:[%s2159_s0 + $0x18] sm:$0xff]  ;;  %v44_v5 = vld [vmem:[%s2159_s0 + $0x20] sm:$0xf]  ;;  %v316_v11 = vld [vmem:[%s2161_s2 + $0x10] sm:$0xff] }
   0x3   :  { %v46_v7 = vpack.c.bf16 %v43_v4, %v42_v2  ;;  %v1670_v8 = vld [vmem:[%s2160_s1] sm:$0xff]   ;;  %v47_v9 = vpack.c.bf16 %v44_v5, %v44_v5  ;;  %338 = vperm.xlu1 %1669, %v316_v11   ;;  %v315_v12 = vld [vmem:[%s2161_s2 + $0x8] sm:$0xff]  ;;  %v317_v13 = vld [vmem:[%s2161_s2 + $0x18] sm:$0xff] }
   0x4   :  { %1522 = vmatprep.subr.bf16.mxu0 %v45_v3  ;;  %1528 = vmatprep.mubr.msk.bf16.mxu0 %vm132_vm0, %v1670_v8  ;;  %v314_v10 = vld [vmem:[%s2161_s2] sm:$0xff]  ;;  %v1671_v15 = vld [vmem:[%s2160_s1 + $0x8] sm:$0xff]   ;;  %v1672_v17 = vld [vmem:[%s2160_s1 + $0x10] sm:$0xff]  }
   0x5   :  { %1523 = vmatpush3.bf16.msra.mxu0 %v45_v3  ;;  %328 = vperm.xlu0 %1668, %v314_v10   ;;  %v171_v14 = vsel %vm169_vm1, %v47_v9, 0  ;;  %v318_v16 = vld [vmem:[%s2161_s2 + $0x20] sm:$0xff]  ;;  %v319_v18 = vld [vmem:[%s2161_s2 + $0x28] sm:$0xff]  ;;  %v320_v19 = vld [vmem:[%s2161_s2 + $0x30] sm:$0xff] }
   0x6   :  { %1524 = vmatprep.subr.bf16.mxu0 %v46_v7  ;;  %v321_v20 = vld [vmem:[%s2161_s2 + $0x38] sm:$0xff]  ;;  %v322_v22 = vld [vmem:[%s2161_s2 + $0x40] sm:$0xff]  ;;  %v323_v24 = vld [vmem:[%s2161_s2 + $0x48] sm:$0xff] }
   0x7   :  { %343 = vperm.xlu1 %1669, %v317_v13   ;;  %v1673_v21 = vld [vmem:[%s2160_s1 + $0x18] sm:$0xff]   ;;  %v1674_v23 = vld [vmem:[%s2160_s1 + $0x20] sm:$0xff]   ;;  %v324_v25 = vld [vmem:[%s2161_s2 + $0x50] sm:$0xff] }
   0x8   :  { %v325_v26 = vld [vmem:[%s2161_s2 + $0x58] sm:$0xff]  ;;  %v1675_v27 = vld [vmem:[%s2160_s1 + $0x28] sm:$0xff]   ;;  %v678_v28 = vld [vmem:[%s2163_s4] sm:$0xff] }
   0x9   :  { %1525 = vmatpush3.bf16.msra.mxu0 %v46_v7  ;;  %333 = vperm.xlu0 %1668, %v315_v12   ;;  %v1676_v29 = vld [vmem:[%s2160_s1 + $0x30] sm:$0xff]   ;;  %v679_v30 = vld [vmem:[%s2163_s4 + $0x8] sm:$0xff]  ;;  %v681_v32 = vld [vmem:[%s2163_s4 + $0x18] sm:$0xff] }
   0xa   :  { %1660 = vmatprep.subr.msk.bf16.mxu0 %vm169_vm1, %v47_v9  ;;  %v680_v31 = vld [vmem:[%s2163_s4 + $0x10] sm:$0xff]  ;;  %v1677_v33 = vld [vmem:[%s2160_s1 + $0x38] sm:$0xff]   ;;  %v682_v34 = vld [vmem:[%s2163_s4 + $0x20] sm:$0xff] }
   0xb   :  { %353 = vperm.xlu1 %1669, %v319_v18   ;;  %v1678_v35 = vld [vmem:[%s2160_s1 + $0x40] sm:$0xff]   ;;  %v683_v36 = vld [vmem:[%s2163_s4 + $0x28] sm:$0xff]  ;;  %v684_v37 = vld [vmem:[%s2163_s4 + $0x30] sm:$0xff] }
   0xc   :  { %v685_v38 = vld [vmem:[%s2163_s4 + $0x38] sm:$0xff]  ;;  %v1679_v39 = vld [vmem:[%s2160_s1 + $0x48] sm:$0xff]   ;;  %v686_v40 = vld [vmem:[%s2163_s4 + $0x40] sm:$0xff] }
   0xd   :  { %1527 = vmatpush3.bf16.msra.mxu0 %v171_v14  ;;  %348 = vperm.xlu0 %1668, %v318_v16   ;;  %v1680_v41 = vld [vmem:[%s2160_s1 + $0x50] sm:$0xff]   ;;  %v687_v42 = vld [vmem:[%s2163_s4 + $0x48] sm:$0xff]  ;;  %v689_v44 = vld [vmem:[%s2163_s4 + $0x58] sm:$0xff] }
   0xe   :  { %v688_v43 = vld [vmem:[%s2163_s4 + $0x50] sm:$0xff] }
   0xf   :  { %363 = vperm.xlu1 %1669, %v321_v20  }
  0x10   :  { %1529 = vmatmul.mubr.msk.bf16.vlgmr.msra.gmra.mrb[0].mxu0 %vm132_vm0, %v1671_v15 }
  0x11   :  { %1532 = vmatprep.mubr.msk.bf16.mxu0 %vm132_vm0, %v1672_v17  ;;  %358 = vperm.xlu0 %1668, %v320_v19  }
  0x13   :  { %373 = vperm.xlu1 %1669, %v323_v24  }
  0x15   :  { %368 = vperm.xlu0 %1668, %v322_v22  }
  0x17   :  { %383 = vperm.xlu1 %1669, %v325_v26  }
  0x18   :  { %1533 = vmatmul.mubr.msk.bf16.gmra.mrb[4].mxu0 %vm132_vm0, %v1673_v21 }
  0x19   :  { %1536 = vmatprep.mubr.msk.bf16.mxu0 %vm132_vm0, %v1674_v23  ;;  %378 = vperm.xlu0 %1668, %v324_v25  }
  0x1b   :  { %697 = vperm.xlu1 %1669, %v679_v30  }
  0x1d   :  { %692 = vperm.xlu0 %1668, %v678_v28  }
  0x1f   :  { %707 = vperm.xlu1 %1669, %v681_v32  }
  0x20   :  { %1537 = vmatmul.mubr.msk.bf16.gmra.mrb[8].mxu0 %vm132_vm0, %v1675_v27 }
  0x21   :  { %1540 = vmatprep.mubr.msk.bf16.mxu0 %vm132_vm0, %v1676_v29  ;;  %702 = vperm.xlu0 %1668, %v680_v31  }
  0x23   :  { %717 = vperm.xlu1 %1669, %v683_v36  }
  0x25   :  { %712 = vperm.xlu0 %1668, %v682_v34  }
  0x27   :  { %727 = vperm.xlu1 %1669, %v685_v38  }
  0x28   :  { %1541 = vmatmul.mubr.msk.bf16.gmra.mrb[12].mxu0 %vm132_vm0, %v1677_v33 }
  0x29   :  { %1544 = vmatprep.mubr.msk.bf16.mxu0 %vm132_vm0, %v1678_v35  ;;  %722 = vperm.xlu0 %1668, %v684_v37  }
  0x2b   :  { %737 = vperm.xlu1 %1669, %v687_v42  }
  0x2d   :  { %732 = vperm.xlu0 %1668, %v686_v40  }
  0x30   :  { %1545 = vmatmul.mubr.msk.bf16.gmra.mrb[16].mxu0 %vm132_vm0, %v1679_v39 }
  0x31   :  { %1548 = vmatprep.mubr.msk.bf16.mxu0 %vm132_vm0, %v1680_v41 }
  0x32   :  { %16 = vsyncpa [#allocation3], 0  ;;  %742 = vperm.xlu0 %1668, %v688_v43   ;;  %v1681_v45 = vld [vmem:[%s2160_s1 + $0x58] sm:$0xff]   ;;  %747 = vperm.xlu1 %1669, %v689_v44   ;;  %v795_v46 = vld [vmem:[%s2165_s6] sm:$0xff]  ;;  %vm500_vm2 = vcmask 785408   ;;  %vm1171_vm3 = vcmask 982016  }
  0x33   :  { %v796_v47 = vld [vmem:[%s2165_s6 + $0x8] sm:$0xff]  ;;  %v797_v48 = vld [vmem:[%s2165_s6 + $0x10] sm:$0xff]  ;;  %v798_v49 = vld [vmem:[%s2165_s6 + $0x18] sm:$0xff]  ;;  %vm1190_vm4 = vcmask 1043456   ;;  %vm1735_vm5 = vmmov 0   ;;  %vm1310_vm6 = vcmask 687104  }
  0x34   :  { %v799_v50 = vld [vmem:[%s2165_s6 + $0x20] sm:$0xff]  ;;  %v800_v51 = vld [vmem:[%s2165_s6 + $0x28] sm:$0xff]  ;;  %v801_v52 = vld [vmem:[%s2165_s6 + $0x30] sm:$0xff]  ;;  %s1736_s1 = smov [#allocation2]  }
  0x35   :  { %v802_v53 = vld [vmem:[%s2165_s6 + $0x38] sm:$0xff]  ;;  %v803_v54 = vld [vmem:[%s2165_s6 + $0x40] sm:$0xff]  ;;  %v804_v55 = vld [vmem:[%s2165_s6 + $0x48] sm:$0xff] }
  0x36   :  { %812 = vperm.xlu0 %1668, %v795_v46   ;;  %817 = vperm.xlu1 %1669, %v796_v47   ;;  %v805_v56 = vld [vmem:[%s2165_s6 + $0x50] sm:$0xff]  ;;  %v806_v57 = vld [vmem:[%s2165_s6 + $0x58] sm:$0xff]  ;;  %v807_v58 = vld [vmem:[%s2165_s6 + $0x60] sm:$0xff] }
  0x37   :  { %v808_v59 = vld [vmem:[%s2165_s6 + $0x68] sm:$0xff]  ;;  %v809_v60 = vld [vmem:[%s2165_s6 + $0x70] sm:$0xff]  ;;  %v1077_v61 = vld [vmem:[%s2167_s8] sm:$0xff] }
  0x38   :  { %1549 = vmatmul.mubr.msk.bf16.gmra.mrb[20].mxu0 %vm132_vm0, %v1681_v45  ;;  %v1078_v62 = vld [vmem:[%s2167_s8 + $0x8] sm:$0xff]  ;;  %v1079_v63 = vld [vmem:[%s2167_s8 + $0x10] sm:$0xff]  ;;  %v1080_v0 = vld [vmem:[%s2167_s8 + $0x18] sm:$0xff] }
  0x39   :  { %v1081_v1 = vld [vmem:[%s2167_s8 + $0x20] sm:$0xff]  ;;  %v1082_v2 = vld [vmem:[%s2167_s8 + $0x28] sm:$0xff]  ;;  %v1083_v3 = vld [vmem:[%s2167_s8 + $0x30] sm:$0xff] }
  0x3a   :  { %822 = vperm.xlu0 %1668, %v797_v48   ;;  %827 = vperm.xlu1 %1669, %v798_v49   ;;  %v1084_v4 = vld [vmem:[%s2167_s8 + $0x38] sm:$0xff]  ;;  %v1085_v5 = vld [vmem:[%s2167_s8 + $0x40] sm:$0xff]  ;;  %v1086_v6 = vld [vmem:[%s2167_s8 + $0x48] sm:$0xff] }
  0x3b   :  { %v1087_v7 = vld [vmem:[%s2167_s8 + $0x50] sm:$0xf]  ;;  %v1293_v8 = vld [vmem:[%s2169_s10] sm:$0xff]  ;;  %v1294_v9 = vld [vmem:[%s2169_s10 + $0x8] sm:$0x3] }
  0x3c   :  { %v1682_v10 = vld [vmem:[%s2162_s3] sm:$0xff]  }
  0x3d   :  { %1564 = vmatprep.mubr.msk.bf16.mxu1 %vm500_vm2, %v1682_v10 }
  0x3e   :  { %832 = vperm.xlu0 %1668, %v799_v50   ;;  %837 = vperm.xlu1 %1669, %v800_v51  }
  0x42   :  { %842 = vperm.xlu0 %1668, %v801_v52   ;;  %847 = vperm.xlu1 %1669, %v802_v53  }
  0x46   :  { %852 = vperm.xlu0 %1668, %v803_v54   ;;  %857 = vperm.xlu1 %1669, %v804_v55  }
  0x4a   :  { %862 = vperm.xlu0 %1668, %v805_v56   ;;  %867 = vperm.xlu1 %1669, %v806_v57  }
  0x4e   :  { %872 = vperm.xlu0 %1668, %v807_v58   ;;  %877 = vperm.xlu1 %1669, %v808_v59  }
  0x52   :  { %882 = vperm.xlu0 %1668, %v809_v60   ;;  %1090 = vperm.xlu1 %1669, %v1077_v61  }
  0x56   :  { %1095 = vperm.xlu0 %1668, %v1078_v62   ;;  %1100 = vperm.xlu1 %1669, %v1079_v63  }
  0x5a   :  { %1105 = vperm.xlu0 %1668, %v1080_v0   ;;  %1110 = vperm.xlu1 %1669, %v1081_v1  }
  0x5e   :  { %1115 = vperm.xlu0 %1668, %v1082_v2   ;;  %1120 = vperm.xlu1 %1669, %v1083_v3  }
  0x62   :  { %1125 = vperm.xlu0 %1668, %v1084_v4   ;;  %1130 = vperm.xlu1 %1669, %v1085_v5  }
  0x66   :  { %1135 = vperm.xlu0 %1668, %v1086_v6   ;;  %1140 = vperm.xlu1 %1669, %v1087_v7  }
  0x6a   :  { %1297 = vperm.xlu0 %1668, %v1293_v8   ;;  %1302 = vperm.xlu1 %1669, %v1294_v9  }
  0x82   :  { %v339_v20 = vpop.permute.xlu1 %338 }
  0x84   :  { %v329_v19 = vpop.permute.xlu0 %328 }
  0x86   :  { %v344_v26 = vpop.permute.xlu1 %343 }
  0x88   :  { %v334_v23 = vpop.permute.xlu0 %333 }
  0x8a   :  { %v354_v31 = vpop.permute.xlu1 %353 }
  0x8c   :  { %v349_v27 = vpop.permute.xlu0 %348 }
  0x8e   :  { %v364_v44 = vpop.permute.xlu1 %363 }
  0x90   :  { %v359_v40 = vpop.permute.xlu0 %358 }
  0x92   :  { %v374_v61 = vpop.permute.xlu1 %373 }
  0x94   :  { %v369_v57 = vpop.permute.xlu0 %368 }
  0x98   :  { %v379_v7 = vpop.permute.xlu0 %378 }
  0xe3   :  { %v1530_v11 = vpop.f32.mrb[0].mxu0 }
  0xe4   :  { %v207_v12 = vpop.f32.mrb[1].mxu0 }
  0xe5   :  { %v1531_v13 = vpop.f32.mrb[2].mxu0 }
  0xe6   :  { %v210_v14 = vpop.f32.mrb[3].mxu0 }
  0xeb   :  { %v1534_v15 = vpop.f32.mrb[4].mxu0 }
  0xec   :  { %v223_v16 = vpop.f32.mrb[5].mxu0 }
  0xed   :  { %v1535_v17 = vpop.f32.mrb[6].mxu0 }
  0xee   :  { %v226_v18 = vpop.f32.mrb[7].mxu0 }
  0xf3   :  { %v1538_v21 = vpop.f32.mrb[8].mxu0 }
  0xf4   :  { %v239_v22 = vpop.f32.mrb[9].mxu0 }
  0xf5   :  { %v2024_v24 = vpop.f32.mrb[10].mxu0 }
  0xf6   :  { %v2026_v25 = vpop.f32.mrb[11].mxu0 }
  0xfb   :  { %v1542_v28 = vpop.f32.mrb[12].mxu0 }
  0xfc   :  { %v304_v29 = vmax.f32 %v1530_v11, %v1542_v28  ;;  %v255_v30 = vpop.f32.mrb[13].mxu0  ;;  %v1686_v28 = vld [vmem:[%s2162_s3 + $0x20] sm:$0xff]  }
  0xfd   :  { %v302_v32 = vmax.f32 %v207_v12, %v255_v30  ;;  %v1543_v33 = vpop.f32.mrb[14].mxu0  ;;  %v1688_v30 = vld [vmem:[%s2162_s3 + $0x30] sm:$0xff]  }
  0xfe   :  { %v388_v34 = vadd.f32 %v339_v20, %v304_v29  ;;  %v305_v35 = vmax.f32 %v1531_v13, %v1543_v33  ;;  %v258_v36 = vpop.f32.mrb[15].mxu0  ;;  %v1687_v29 = vld [vmem:[%s2162_s3 + $0x28] sm:$0xff]  }
  0xff   :  { %v386_v37 = vadd.f32 %v329_v19, %v302_v32  ;;  %v303_v38 = vmax.f32 %v210_v14, %v258_v36  ;;  %v384_v14 = vpop.permute.xlu1 %383  ;;  %v1690_v32 = vld [vmem:[%s2162_s3 + $0x40] sm:$0xff]   ;;  %v1691_v33 = vld [vmem:[%s2162_s3 + $0x48] sm:$0xff]  }
 0x100   :  { %v389_v39 = vadd.f32 %v344_v26, %v305_v35  ;;  %v400_v42 = vmax.f32 %v388_v34, 0.0  ;;  %v1692_v34 = vld [vmem:[%s2162_s3 + $0x50] sm:$0xff]   ;;  %v1693_v35 = vld [vmem:[%s2162_s3 + $0x58] sm:$0xff]   ;;  %v1694_v36 = vld [vmem:[%s2164_s5] sm:$0xff]  }
 0x101   :  { %v387_v41 = vadd.f32 %v334_v23, %v303_v38  ;;  %v398_v45 = vmax.f32 %v386_v37, 0.0  ;;  %1600 = vmatprep.mubr.msk.bf16.mxu0 %vm500_vm2, %v1694_v36 }
 0x102   :  { %v401_v43 = vmax.f32 %v389_v39, 0.0 }
 0x103   :  { %v399_v46 = vmax.f32 %v387_v41, 0.0  ;;  %v1546_v47 = vpop.f32.mrb[16].mxu0 }
 0x104   :  { %v308_v48 = vmax.f32 %v1534_v15, %v1546_v47  ;;  %v271_v49 = vpop.f32.mrb[17].mxu0  ;;  %v435_v50 = vpack.c.bf16 %v401_v43, %v400_v42 }
 0x105   :  { %v306_v51 = vmax.f32 %v223_v16, %v271_v49  ;;  %v1547_v52 = vpop.f32.mrb[18].mxu0  ;;  %v434_v53 = vpack.c.bf16 %v399_v46, %v398_v45  ;;  %v693_v45 = vpop.permute.xlu0 %692 }
 0x106   :  { %v392_v54 = vadd.f32 %v359_v40, %v308_v48  ;;  %v309_v55 = vmax.f32 %v1535_v17, %v1547_v52  ;;  %v274_v56 = vpop.f32.mrb[19].mxu0  ;;  %v698_v46 = vpop.permute.xlu1 %697 }
 0x107   :  { %v390_v58 = vadd.f32 %v349_v27, %v306_v51  ;;  %v307_v59 = vmax.f32 %v226_v18, %v274_v56  ;;  %1552 = vmatprep.subr.bf16.mxu1 %v434_v53  ;;  %v1685_v27 = vld [vmem:[%s2162_s3 + $0x18] sm:$0xff]  }
 0x108   :  { %v393_v60 = vadd.f32 %v364_v44, %v309_v55  ;;  %1553 = vmatpush3.bf16.msra.mxu1 %v434_v53  ;;  %v404_v63 = vmax.f32 %v392_v54, 0.0 }
 0x109   :  { %v391_v62 = vadd.f32 %v354_v31, %v307_v59  ;;  %1554 = vmatprep.subr.bf16.mxu1 %v435_v50  ;;  %v402_v1 = vmax.f32 %v390_v58, 0.0  ;;  %v1689_v31 = vld [vmem:[%s2162_s3 + $0x38] sm:$0xff]   ;;  %v703_v49 = vpop.permute.xlu0 %702 }
 0x10a   :  { %v405_v0 = vmax.f32 %v393_v60, 0.0  ;;  %v708_v52 = vpop.permute.xlu1 %707 }
 0x10b   :  { %v403_v2 = vmax.f32 %v391_v62, 0.0  ;;  %v1550_v3 = vpop.f32.mrb[20].mxu0 }
 0x10c   :  { %v312_v4 = vmax.f32 %v1538_v21, %v1550_v3  ;;  %v287_v5 = vpop.f32.mrb[21].mxu0  ;;  %1555 = vmatpush3.bf16.msra.mxu1 %v435_v50  ;;  %v437_v6 = vpack.c.bf16 %v405_v0, %v404_v63 }
 0x10d   :  { %v310_v8 = vmax.f32 %v239_v22, %v287_v5  ;;  %v1551_v9 = vpop.f32.mrb[22].mxu0  ;;  %v436_v10 = vpack.c.bf16 %v403_v2, %v402_v1  ;;  %v713_v53 = vpop.permute.xlu0 %712 }
 0x10e   :  { %v396_v11 = vadd.f32 %v379_v7, %v312_v4  ;;  %v313_v12 = vmax.f32 %v2024_v24, %v1551_v9  ;;  %v290_v13 = vpop.f32.mrb[23].mxu0  ;;  %v1683_v24 = vld [vmem:[%s2162_s3 + $0x8] sm:$0xff]  }
 0x10f   :  { %v394_v15 = vadd.f32 %v369_v57, %v310_v8  ;;  %v311_v16 = vmax.f32 %v2026_v25, %v290_v13  ;;  %1556 = vmatprep.subr.bf16.mxu1 %v436_v10  ;;  %v1684_v25 = vld [vmem:[%s2162_s3 + $0x10] sm:$0xff]   ;;  %v718_v57 = vpop.permute.xlu1 %717  ;;  %s1365_s3 = sshll.u32 %s1736_s1, 4  ;;  %s1366_s3 = int_to_ptr.vmem [resolvable:$true] %s1365_s3 }
 0x110   :  { %v397_v17 = vadd.f32 %v384_v14, %v313_v12  ;;  %1557 = vmatpush3.bf16.msra.mxu1 %v436_v10  ;;  %v408_v19 = vmax.f32 %v396_v11, 0.0  ;;  %s1709_s24 = scalar_lea.vmem %s1366_s3, 256  ;;  %p1714_p1 = scmp.lt.s32.totalorder %s1366_s3, %s1366_s3 }
 0x111   :  { %v395_v18 = vadd.f32 %v374_v61, %v311_v16  ;;  %1558 = vmatprep.subr.bf16.mxu1 %v437_v6  ;;  %v406_v21 = vmax.f32 %v394_v15, 0.0  ;;  %v723_v2 = vpop.permute.xlu0 %722  ;;  %p1710_p0 = scmp.ne.s32.totalorder %s1366_s3, %s1709_s24  ;;  %p1715_p2 = scmp.lt.s32.totalorder %s1709_s24, %s1709_s24 }
 0x112   :  { %v409_v20 = vmax.f32 %v397_v17, 0.0 }
 0x113   :  { %v407_v23 = vmax.f32 %v395_v18, 0.0  ;;  %p1716_p3 = por %p1715_p2, %p1714_p1 }
 0x114   :  { %1559 = vmatpush3.bf16.msra.mxu1 %v437_v6  ;;  %v439_v22 = vpack.c.bf16 %v409_v20, %v408_v19  ;;  %v728_v6 = vpop.permute.xlu1 %727 }
 0x115   :  { %v438_v26 = vpack.c.bf16 %v407_v23, %v406_v21  ;;  %v733_v19 = vpop.permute.xlu0 %732  ;;  %p1717_p4 = pnand %p1716_p3, %p1710_p0 }
 0x117   :  { %1560 = vmatprep.subr.bf16.mxu1 %v438_v26 }
 0x118   :  { %1561 = vmatpush3.bf16.msra.mxu1 %v438_v26 }
 0x119   :  { %1562 = vmatprep.subr.bf16.mxu1 %v439_v22 }
 0x11c   :  { %1563 = vmatpush3.bf16.msra.mxu1 %v439_v22  ;;  %v738_v22 = vpop.permute.xlu1 %737 }
 0x11f   :  { %1565 = vmatmul.mubr.msk.bf16.vlgmr.msra.gmra.mrb[0].mxu1 %vm500_vm2, %v1683_v24 }
 0x120   :  { %1568 = vmatprep.mubr.msk.bf16.mxu1 %vm500_vm2, %v1684_v25 }
 0x127   :  { %1569 = vmatmul.mubr.msk.bf16.gmra.mrb[4].mxu1 %vm500_vm2, %v1685_v27 }
 0x128   :  { %1572 = vmatprep.mubr.msk.bf16.mxu1 %vm500_vm2, %v1686_v28 }
 0x12f   :  { %1573 = vmatmul.mubr.msk.bf16.gmra.mrb[8].mxu1 %vm500_vm2, %v1687_v29 }
 0x130   :  { %1576 = vmatprep.mubr.msk.bf16.mxu1 %vm500_vm2, %v1688_v30 }
 0x137   :  { %1577 = vmatmul.mubr.msk.bf16.gmra.mrb[12].mxu1 %vm500_vm2, %v1689_v31 }
 0x138   :  { %1580 = vmatprep.mubr.msk.bf16.mxu1 %vm500_vm2, %v1690_v32 }
 0x13f   :  { %1581 = vmatmul.mubr.msk.bf16.gmra.mrb[16].mxu1 %vm500_vm2, %v1691_v33  ;;  %v743_v33 = vpop.permute.xlu0 %742 }
 0x140   :  { %1584 = vmatprep.mubr.msk.bf16.mxu1 %vm500_vm2, %v1692_v34 }
 0x147   :  { %1585 = vmatmul.mubr.msk.bf16.gmra.mrb[20].mxu1 %vm500_vm2, %v1693_v35 }
 0x1f2   :  { %v1566_v37 = vpop.f32.mrb[0].mxu1 }
 0x1f3   :  { %v571_v38 = vpop.f32.mrb[1].mxu1 }
 0x1f4   :  { %v1567_v39 = vpop.f32.mrb[2].mxu1 }
 0x1f5   :  { %v574_v40 = vpop.f32.mrb[3].mxu1 }
 0x1fa   :  { %v1570_v41 = vpop.f32.mrb[4].mxu1 }
 0x1fb   :  { %v587_v42 = vpop.f32.mrb[5].mxu1 }
 0x1fc   :  { %v1571_v43 = vpop.f32.mrb[6].mxu1 }
 0x1fd   :  { %v590_v44 = vpop.f32.mrb[7].mxu1 }
 0x202   :  { %v1574_v47 = vpop.f32.mrb[8].mxu1 }
 0x203   :  { %v603_v48 = vpop.f32.mrb[9].mxu1 }
 0x204   :  { %v2078_v50 = vpop.f32.mrb[10].mxu1 }
 0x205   :  { %v2080_v51 = vpop.f32.mrb[11].mxu1 }
 0x20a   :  { %v1578_v54 = vpop.f32.mrb[12].mxu1 }
 0x20b   :  { %v668_v55 = vmax.f32 %v1566_v37, %v1578_v54  ;;  %v619_v56 = vpop.f32.mrb[13].mxu1  ;;  %v1698_v54 = vld [vmem:[%s2164_s5 + $0x20] sm:$0xff]  }
 0x20c   :  { %v666_v58 = vmax.f32 %v571_v38, %v619_v56  ;;  %v1579_v59 = vpop.f32.mrb[14].mxu1  ;;  %v1700_v56 = vld [vmem:[%s2164_s5 + $0x30] sm:$0xff]  }
 0x20d   :  { %v752_v60 = vadd.f32 %v703_v49, %v668_v55  ;;  %v669_v61 = vmax.f32 %v1567_v39, %v1579_v59  ;;  %v622_v62 = vpop.f32.mrb[15].mxu1  ;;  %v1699_v55 = vld [vmem:[%s2164_s5 + $0x28] sm:$0xff]   ;;  %v813_v59 = vpop.permute.xlu0 %812 }
 0x20e   :  { %v750_v63 = vadd.f32 %v693_v45, %v666_v58  ;;  %v667_v0 = vmax.f32 %v574_v40, %v622_v62  ;;  %v748_v40 = vpop.permute.xlu1 %747  ;;  %v1702_v58 = vld [vmem:[%s2166_s7] sm:$0xff]  }
 0x20f   :  { %v753_v1 = vadd.f32 %v708_v52, %v669_v61  ;;  %v764_v4 = vmax.f32 %v752_v60, 0.0  ;;  %1632 = vmatprep.mubr.msk.bf16.mxu1 %vm1171_vm3, %v1702_v58 }
 0x210   :  { %v751_v3 = vadd.f32 %v698_v46, %v667_v0  ;;  %v762_v7 = vmax.f32 %v750_v63, 0.0 }
 0x211   :  { %v765_v5 = vmax.f32 %v753_v1, 0.0  ;;  %v823_v61 = vpop.permute.xlu0 %822 }
 0x212   :  { %v763_v8 = vmax.f32 %v751_v3, 0.0  ;;  %v1582_v9 = vpop.f32.mrb[16].mxu1  ;;  %v818_v60 = vpop.permute.xlu1 %817 }
 0x213   :  { %v672_v10 = vmax.f32 %v1570_v41, %v1582_v9  ;;  %v635_v11 = vpop.f32.mrb[17].mxu1  ;;  %v790_v12 = vpack.c.bf16 %v765_v5, %v764_v4 }
 0x214   :  { %v670_v13 = vmax.f32 %v587_v42, %v635_v11  ;;  %v1583_v14 = vpop.f32.mrb[18].mxu1  ;;  %v789_v15 = vpack.c.bf16 %v763_v8, %v762_v7 }
 0x215   :  { %v756_v16 = vadd.f32 %v723_v2, %v672_v10  ;;  %v673_v17 = vmax.f32 %v1571_v43, %v1583_v14  ;;  %v638_v18 = vpop.f32.mrb[19].mxu1  ;;  %v833_v63 = vpop.permute.xlu0 %832 }
 0x216   :  { %v754_v20 = vadd.f32 %v713_v53, %v670_v13  ;;  %v671_v21 = vmax.f32 %v590_v44, %v638_v18  ;;  %1588 = vmatprep.subr.bf16.mxu0 %v789_v15  ;;  %v1697_v53 = vld [vmem:[%s2164_s5 + $0x18] sm:$0xff]   ;;  %v828_v62 = vpop.permute.xlu1 %827 }
 0x217   :  { %v757_v23 = vadd.f32 %v728_v6, %v673_v17  ;;  %1589 = vmatpush3.bf16.msra.mxu0 %v789_v15  ;;  %v768_v24 = vmax.f32 %v756_v16, 0.0 }
 0x218   :  { %v755_v26 = vadd.f32 %v718_v57, %v671_v21  ;;  %1590 = vmatprep.subr.bf16.mxu0 %v790_v12  ;;  %v766_v27 = vmax.f32 %v754_v20, 0.0  ;;  %v1701_v57 = vld [vmem:[%s2164_s5 + $0x38] ss:$0 sps:$4 sm:$0xff]  }
 0x219   :  { %v769_v25 = vmax.f32 %v757_v23, 0.0  ;;  %v843_v2 = vpop.permute.xlu0 %842 }
 0x21a   :  { %v767_v28 = vmax.f32 %v755_v26, 0.0  ;;  %v1586_v29 = vpop.f32.mrb[20].mxu1  ;;  %v838_v0 = vpop.permute.xlu1 %837 }
 0x21b   :  { %v676_v30 = vmax.f32 %v1574_v47, %v1586_v29  ;;  %v651_v31 = vpop.f32.mrb[21].mxu1  ;;  %1591 = vmatpush3.bf16.msra.mxu0 %v790_v12  ;;  %v792_v32 = vpack.c.bf16 %v769_v25, %v768_v24 }
 0x21c   :  { %v674_v34 = vmax.f32 %v603_v48, %v651_v31  ;;  %v1587_v35 = vpop.f32.mrb[22].mxu1  ;;  %v791_v36 = vpack.c.bf16 %v767_v28, %v766_v27 }
 0x21d   :  { %v760_v37 = vadd.f32 %v743_v33, %v676_v30  ;;  %v677_v38 = vmax.f32 %v2078_v50, %v1587_v35  ;;  %v654_v39 = vpop.f32.mrb[23].mxu1  ;;  %v1695_v50 = vld [vmem:[%s2164_s5 + $0x8] sm:$0xff]   ;;  %v853_v15 = vpop.permute.xlu0 %852 }
 0x21e   :  { %v758_v41 = vadd.f32 %v733_v19, %v674_v34  ;;  %v675_v42 = vmax.f32 %v2080_v51, %v654_v39  ;;  %1592 = vmatprep.subr.bf16.mxu0 %v791_v36  ;;  %v1696_v51 = vld [vmem:[%s2164_s5 + $0x10] sm:$0xff]   ;;  %v848_v12 = vpop.permute.xlu1 %847 }
 0x21f   :  { %v761_v43 = vadd.f32 %v748_v40, %v677_v38  ;;  %1593 = vmatpush3.bf16.msra.mxu0 %v791_v36  ;;  %v772_v45 = vmax.f32 %v760_v37, 0.0 }
 0x220   :  { %v759_v44 = vadd.f32 %v738_v22, %v675_v42  ;;  %1594 = vmatprep.subr.bf16.mxu0 %v792_v32  ;;  %v770_v47 = vmax.f32 %v758_v41, 0.0 }
 0x221   :  { %v773_v46 = vmax.f32 %v761_v43, 0.0  ;;  %v863_v27 = vpop.permute.xlu0 %862 }
 0x222   :  { %v771_v49 = vmax.f32 %v759_v44, 0.0  ;;  %v858_v24 = vpop.permute.xlu1 %857 }
 0x223   :  { %1595 = vmatpush3.bf16.msra.mxu0 %v792_v32  ;;  %v794_v48 = vpack.c.bf16 %v773_v46, %v772_v45 }
 0x224   :  { %v793_v52 = vpack.c.bf16 %v771_v49, %v770_v47 }
 0x225   :  { %v873_v40 = vpop.permute.xlu0 %872 }
 0x226   :  { %1596 = vmatprep.subr.bf16.mxu0 %v793_v52  ;;  %v868_v37 = vpop.permute.xlu1 %867 }
 0x227   :  { %1597 = vmatpush3.bf16.msra.mxu0 %v793_v52 }
 0x228   :  { %1598 = vmatprep.subr.bf16.mxu0 %v794_v48 }
 0x22b   :  { %1599 = vmatpush3.bf16.msra.mxu0 %v794_v48 }
 0x22e   :  { %1601 = vmatmul.mubr.msk.bf16.vlgmr.msra.gmra.mrb[24].mxu0 %vm500_vm2, %v1695_v50  ;;  %v883_v50 = vpop.permute.xlu0 %882 }
 0x22f   :  { %1604 = vmatprep.mubr.msk.bf16.mxu0 %vm500_vm2, %v1696_v51 }
 0x236   :  { %1605 = vmatmul.mubr.msk.bf16.gmra.mrb[28].mxu0 %vm500_vm2, %v1697_v53 }
 0x237   :  { %1608 = vmatprep.mubr.msk.bf16.mxu0 %vm500_vm2, %v1698_v54 }
 0x23e   :  { %1609 = vmatmul.mubr.msk.bf16.gmra.mrb[32].mxu0 %vm500_vm2, %v1699_v55 }
 0x23f   :  { %1612 = vmatprep.mubr.msk.bf16.mxu0 %vm500_vm2, %v1700_v56  ;;  %v878_v56 = vpop.permute.xlu1 %877 }
 0x246   :  { %1613 = vmatmul.mubr.msk.bf16.gmra.mrb[36].mxu0 %vm500_vm2, %v1701_v57 }
 0x301   :  { %v1602_v1 = vpop.f32.mrb[24].mxu0 }
 0x302   :  { %v990_v3 = vadd.f32 %v1602_v1, %v823_v61  ;;  %v981_v4 = vpop.f32.mrb[25].mxu0  ;;  %v1703_v1 = vld [vmem:[%s2166_s7 + $0x8] sm:$0xff]  }
 0x303   :  { %v982_v5 = vadd.f32 %v981_v4, %v813_v59  ;;  %v1603_v6 = vpop.f32.mrb[26].mxu0  ;;  %v1706_v4 = vld [vmem:[%s2166_s7 + $0x20] sm:$0xff]  }
 0x304   :  { %v993_v7 = vadd.f32 %v1603_v6, %v828_v62  ;;  %v984_v8 = vpop.f32.mrb[27].mxu0  ;;  %v1045_v10 = vmax.f32 %v990_v3, 0.0  ;;  %v1705_v3 = vld [vmem:[%s2166_s7 + $0x18] sm:$0xff]   ;;  %v1734_v6 = vmov 0.0  }
 0x305   :  { %v985_v9 = vadd.f32 %v984_v8, %v818_v60  ;;  %v1043_v13 = vmax.f32 %v982_v5, 0.0  ;;  %v1707_v5 = vld [vmem:[%s2166_s7 + $0x28] ss:$0 sps:$4 sm:$0x33]   ;;  %1644 = vmatprep.subr.bf16.mxu0 %v1734_v6  ;;  %1656 = vmatprep.mubr.msk.bf16.mxu0 %vm1735_vm5, %v1734_v6  ;;  %v1096_v8 = vpop.permute.xlu0 %1095 }
 0x306   :  { %v1046_v11 = vmax.f32 %v993_v7, 0.0  ;;  %v1091_v7 = vpop.permute.xlu1 %1090 }
 0x307   :  { %v1044_v14 = vmax.f32 %v985_v9, 0.0 }
 0x308   :  { %v1070_v16 = vpack.c.bf16 %v1046_v11, %v1045_v10 }
 0x309   :  { %v1069_v17 = vpack.c.bf16 %v1044_v14, %v1043_v13  ;;  %v1606_v18 = vpop.f32.mrb[28].mxu0  ;;  %v1106_v10 = vpop.permute.xlu0 %1105 }
 0x30a   :  { %v1006_v19 = vadd.f32 %v1606_v18, %v843_v2  ;;  %v997_v20 = vpop.f32.mrb[29].mxu0  ;;  %v1704_v2 = vld [vmem:[%s2166_s7 + $0x10] sm:$0xff]   ;;  %v1101_v9 = vpop.permute.xlu1 %1100 }
 0x30b   :  { %v998_v21 = vadd.f32 %v997_v20, %v833_v63  ;;  %v1607_v23 = vpop.f32.mrb[30].mxu0  ;;  %1616 = vmatprep.subr.bf16.mxu1 %v1069_v17 }
 0x30c   :  { %v1009_v22 = vadd.f32 %v1607_v23, %v848_v12  ;;  %v1000_v26 = vpop.f32.mrb[31].mxu0  ;;  %1617 = vmatpush3.bf16.msra.mxu1 %v1069_v17  ;;  %v1049_v28 = vmax.f32 %v1006_v19, 0.0 }
 0x30d   :  { %v1001_v25 = vadd.f32 %v1000_v26, %v838_v0  ;;  %1618 = vmatprep.subr.bf16.mxu1 %v1070_v16  ;;  %v1047_v30 = vmax.f32 %v998_v21, 0.0  ;;  %v1116_v17 = vpop.permute.xlu0 %1115 }
 0x30e   :  { %v1050_v29 = vmax.f32 %v1009_v22, 0.0  ;;  %v1111_v11 = vpop.permute.xlu1 %1110 }
 0x30f   :  { %v1048_v31 = vmax.f32 %v1001_v25, 0.0 }
 0x310   :  { %v1072_v32 = vpack.c.bf16 %v1050_v29, %v1049_v28  ;;  %1619 = vmatpush3.bf16.msra.mxu1 %v1070_v16 }
 0x311   :  { %v1071_v33 = vpack.c.bf16 %v1048_v31, %v1047_v30  ;;  %v1610_v34 = vpop.f32.mrb[32].mxu0  ;;  %v1126_v29 = vpop.permute.xlu0 %1125 }
 0x312   :  { %v1022_v35 = vadd.f32 %v1610_v34, %v863_v27  ;;  %v1013_v36 = vpop.f32.mrb[33].mxu0  ;;  %v1121_v20 = vpop.permute.xlu1 %1120 }
 0x313   :  { %v1014_v38 = vadd.f32 %v1013_v36, %v853_v15  ;;  %v1611_v39 = vpop.f32.mrb[34].mxu0  ;;  %1620 = vmatprep.subr.bf16.mxu1 %v1071_v33 }
 0x314   :  { %v1025_v41 = vadd.f32 %v1611_v39, %v868_v37  ;;  %v1016_v42 = vpop.f32.mrb[35].mxu0  ;;  %1621 = vmatpush3.bf16.msra.mxu1 %v1071_v33  ;;  %v1053_v44 = vmax.f32 %v1022_v35, 0.0 }
 0x315   :  { %v1017_v43 = vadd.f32 %v1016_v42, %v858_v24  ;;  %1622 = vmatprep.subr.bf16.mxu1 %v1072_v32  ;;  %v1051_v46 = vmax.f32 %v1014_v38, 0.0 }
 0x316   :  { %v1054_v45 = vmax.f32 %v1025_v41, 0.0 }
 0x317   :  { %v1052_v47 = vmax.f32 %v1017_v43, 0.0 }
 0x318   :  { %v1074_v49 = vpack.c.bf16 %v1054_v45, %v1053_v44  ;;  %1623 = vmatpush3.bf16.msra.mxu1 %v1072_v32  ;;  %v1131_v32 = vpop.permute.xlu1 %1130 }
 0x319   :  { %v1073_v48 = vpack.c.bf16 %v1052_v47, %v1051_v46  ;;  %v1614_v52 = vpop.f32.mrb[36].mxu0 }
 0x31a   :  { %v1029_v51 = vpop.f32.mrb[37].mxu0  ;;  %v1038_v53 = vadd.f32 %v1614_v52, %v883_v50  ;;  %v1136_v52 = vpop.permute.xlu0 %1135 }
 0x31b   :  { %v1030_v54 = vadd.f32 %v1029_v51, %v873_v40  ;;  %v1615_v55 = vpop.f32.mrb[38].mxu0  ;;  %1624 = vmatprep.subr.bf16.mxu1 %v1073_v48 }
 0x31c   :  { %v1032_v57 = vpop.f32.mrb[39].mxu0  ;;  %1625 = vmatpush3.bf16.msra.mxu1 %v1073_v48  ;;  %v1057_v59 = vmax.f32 %v1038_v53, 0.0  ;;  %v1141_v43 = vpop.permute.xlu1 %1140 }
 0x31d   :  { %v1033_v58 = vadd.f32 %v1032_v57, %v878_v56  ;;  %1626 = vmatprep.subr.bf16.mxu1 %v1074_v49  ;;  %v1055_v60 = vmax.f32 %v1030_v54, 0.0 }
 0x31e   :  { %v1076_v63 = vpack.c.bf16 %v1057_v59, %v1057_v59  ;;  %v1708_v59 = vld [vmem:[%s2168_s9] sm:$0x1f]  }
 0x31f   :  { %v1056_v61 = vmax.f32 %v1033_v58, 0.0 }
 0x320   :  { %1627 = vmatpush3.bf16.msra.mxu1 %v1074_v49  ;;  %v1192_v0 = vsel %vm1190_vm4, %v1076_v63, 0 }
 0x321   :  { %v1075_v62 = vpack.c.bf16 %v1056_v61, %v1055_v60  ;;  %v1298_v60 = vpop.permute.xlu0 %1297 }
 0x323   :  { %1628 = vmatprep.subr.bf16.mxu1 %v1075_v62 }
 0x324   :  { %1629 = vmatpush3.bf16.msra.mxu1 %v1075_v62 }
 0x325   :  { %1661 = vmatprep.subr.msk.bf16.mxu1 %vm1190_vm4, %v1076_v63 }
 0x328   :  { %1631 = vmatpush3.bf16.msra.mxu1 %v1192_v0  ;;  %v1303_v0 = vpop.permute.xlu1 %1302 }
 0x32b   :  { %1633 = vmatmul.mubr.msk.bf16.vlgmr.msra.gmra.mrb[24].mxu1 %vm1171_vm3, %v1703_v1 }
 0x32c   :  { %1636 = vmatprep.mubr.msk.bf16.mxu1 %vm1171_vm3, %v1704_v2 }
 0x333   :  { %1637 = vmatmul.mubr.msk.bf16.gmra.mrb[28].mxu1 %vm1171_vm3, %v1705_v3 }
 0x334   :  { %1640 = vmatprep.mubr.msk.bf16.mxu1 %vm1171_vm3, %v1706_v4 }
 0x33b   :  { %1641 = vmatmul.mubr.msk.bf16.gmra.mrb[32].mxu1 %vm1171_vm3, %v1707_v5 }
 0x3fe   :  { %v1634_v12 = vpop.f32.mrb[24].mxu1 }
 0x3ff   :  { %v1237_v13 = vadd.f32 %v1634_v12, %v1101_v9  ;;  %v1228_v14 = vpop.f32.mrb[25].mxu1 }
 0x400   :  { %v1229_v15 = vadd.f32 %v1228_v14, %v1091_v7  ;;  %v1635_v16 = vpop.f32.mrb[26].mxu1 }
 0x401   :  { %v1240_v18 = vadd.f32 %v1635_v16, %v1106_v10  ;;  %v1231_v19 = vpop.f32.mrb[27].mxu1  ;;  %v1276_v23 = vmax.f32 %v1237_v13, 0.0 }
 0x402   :  { %v1232_v21 = vadd.f32 %v1231_v19, %v1096_v8  ;;  %v1274_v26 = vmax.f32 %v1229_v15, 0.0 }
 0x403   :  { %v1277_v22 = vmax.f32 %v1240_v18, 0.0 }
 0x404   :  { %v1275_v24 = vmax.f32 %v1232_v21, 0.0 }
 0x405   :  { %v1288_v25 = vpack.c.bf16 %v1277_v22, %v1276_v23 }
 0x406   :  { %v1287_v27 = vpack.c.bf16 %v1275_v24, %v1274_v26  ;;  %v1638_v28 = vpop.f32.mrb[28].mxu1 }
 0x407   :  { %v1253_v30 = vadd.f32 %v1638_v28, %v1121_v20  ;;  %v1244_v31 = vpop.f32.mrb[29].mxu1 }
 0x408   :  { %v1245_v33 = vadd.f32 %v1244_v31, %v1111_v11  ;;  %v1639_v34 = vpop.f32.mrb[30].mxu1  ;;  %1645 = vmatpush3.bf16.msra.mxu0 %v1287_v27 }
 0x409   :  { %v1256_v35 = vadd.f32 %v1639_v34, %v1126_v29  ;;  %v1247_v36 = vpop.f32.mrb[31].mxu1  ;;  %1646 = vmatprep.subr.bf16.mxu0 %v1734_v6  ;;  %v1280_v38 = vmax.f32 %v1253_v30, 0.0 }
 0x40a   :  { %v1248_v37 = vadd.f32 %v1247_v36, %v1116_v17  ;;  %v1278_v40 = vmax.f32 %v1245_v33, 0.0 }
 0x40b   :  { %v1281_v39 = vmax.f32 %v1256_v35, 0.0 }
 0x40c   :  { %v1279_v41 = vmax.f32 %v1248_v37, 0.0  ;;  %1647 = vmatpush3.bf16.msra.mxu0 %v1288_v25 }
 0x40d   :  { %v1290_v42 = vpack.c.bf16 %v1281_v39, %v1280_v38  ;;  %1648 = vmatprep.subr.bf16.mxu0 %v1734_v6 }
 0x40e   :  { %v1289_v44 = vpack.c.bf16 %v1279_v41, %v1278_v40  ;;  %v1642_v45 = vpop.f32.mrb[32].mxu1 }
 0x40f   :  { %v1269_v46 = vadd.f32 %v1642_v45, %v1141_v43  ;;  %v1260_v47 = vpop.f32.mrb[33].mxu1 }
 0x410   :  { %v1261_v49 = vadd.f32 %v1260_v47, %v1131_v32  ;;  %v1643_v48 = vpop.f32.mrb[34].mxu1  ;;  %1649 = vmatpush3.bf16.msra.mxu0 %v1289_v44 }
 0x411   :  { %v1263_v50 = vpop.f32.mrb[35].mxu1  ;;  %1650 = vmatprep.subr.bf16.mxu0 %v1734_v6  ;;  %v1284_v53 = vmax.f32 %v1269_v46, 0.0 }
 0x412   :  { %v1264_v51 = vadd.f32 %v1263_v50, %v1136_v52  ;;  %v1282_v54 = vmax.f32 %v1261_v49, 0.0 }
 0x413   :  { %v1292_v57 = vpack.c.bf16 %v1284_v53, %v1284_v53 }
 0x414   :  { %v1283_v55 = vmax.f32 %v1264_v51, 0.0  ;;  %1651 = vmatpush3.bf16.msra.mxu0 %v1290_v42 }
 0x415   :  { %1652 = vmatprep.subr.bf16.mxu0 %v1734_v6  ;;  %v1315_v58 = vsel %vm169_vm1, %v1292_v57, 0 }
 0x416   :  { %v1291_v56 = vpack.c.bf16 %v1283_v55, %v1282_v54 }
 0x418   :  { %1653 = vmatpush3.bf16.msra.mxu0 %v1291_v56 }
 0x419   :  { %1654 = vmatprep.subr.bf16.mxu0 %v1734_v6 }
 0x41c   :  { %1655 = vmatpush3.bf16.msra.mxu0 %v1315_v58 }
 0x41f   :  { %1657 = vmatmul.mubr.msk.bf16.vlgmr.msra.gmra.mrb[40].mxu0 %vm1310_vm6, %v1708_v59 }
 0x4f2   :  { %v1351_v61 = vpop.f32.mrb[40].mxu0 }
 0x4f3   :  { %v1352_v62 = vadd.f32 %v1351_v61, %v1298_v60  ;;  %v1658_v63 = vpop.f32.mrb[41].mxu0 }
 0x4f4   :  { %v1354_v1 = vpop.f32.mrb[42].mxu0 }
 0x4f5   :  { %1358 = vst [vmem:[#allocation2] sm:$0xff] %v1352_v62  ;;  %v1355_v2 = vadd.f32 %v1354_v1, %v1303_v0  ;;  %v1659_v3 = vpop.f32.mrb[43].mxu0 }
 0x4f7   :  { %1359 = vst [vmem:[#allocation2 + $0x8] sm:$0x3] %v1355_v2 }
 0x4f8   :  { %1720 = shalt.err (!%p1717_p4)
}
 0x4f9   :  { %s1721_s8 = scalar_lea.hbm %s2170_s11, 256 }
 0x4fa   :  { %p1722_p5 = scmp.ne.s32.totalorder %s2170_s11, %s1721_s8  ;;  %p1725_p6 = scmp.lt.u32.totalorder %s1721_s8, %s2170_s11 }
 0x4fc   :  { %p1727_p7 = pnand %p1725_p6, %p1722_p5 }
 0x4fe   :  { %1730 = shalt.err (!%p1727_p7)
}
 0x4ff   :  { %s1737_s2 = smov 128   ;;  %s1738_s6 = smov 8  }
 0x500   :  { %1371 = dma.vmem_to_hbm [thread:$0]  %s1366_s3, 256, %s2170_s11, [#allocation3], %s1737_s2, %s1737_s2, %s1738_s6  }
 0x501   :  { %1731 = dma.done.wait [#allocation3], 256  }
 0x502   :  { %1732 = vsyncadd [#allocation3], 4294967040 }
 0x503   :  { %1375 = vsyncpa [#allocation3], 1 }

</bundles_post_ra>
